<compile_context>
chip_gen: v5e
topology: v5e:2x2
jax: 0.10.0
libtpu: 0.0.40
codegen_flags: <defaults>
</compile_context>

<pallas_src>
import jax
import jax.numpy as jnp
from jax.experimental import pallas as pl
from jax.experimental.pallas import tpu as pltpu

_LANE = 128
_SUBLANE = 8


def _normalize_kernel(x_ref, o_ref):
    # Works for both block layouts (4-D lane-dense and 3-D flat): the channel
    # axis is always axis 1 of the block, so the reduction never mixes the
    # (possibly ragged / garbage) spatial padding lanes across positions.
    x = x_ref[...]
    # f32-accumulated channel sum without forcing a persistent f32 copy of a
    # sub-f32 block to stay live.
    denom = jnp.sum(x, axis=1, keepdims=True, dtype=jnp.float32)
    # One reciprocal per spatial element instead of C divides per element.
    inv = pl.reciprocal(denom, approx=False)
    o_ref[...] = (x.astype(jnp.float32) * inv).astype(o_ref.dtype)


def normalization_layer(x: jax.Array) -> jax.Array:
    """Pallas equivalent of `x / torch.sum(x, dim=1, keepdim=True)` (NCHW)."""
    B, C, H, W = x.shape
    HW = H * W
    dtype = x.dtype
    itemsize = jnp.dtype(dtype).itemsize
    total_bytes = B * C * HW * itemsize

    # ---- per-generation VMEM budget ----------------------------------------
    try:
        vmem_cap = int(pltpu.get_tpu_info().vmem_capacity_bytes)
    except Exception:
        vmem_cap = 64 * 1024 * 1024            # conservative: assume v7x
    vmem_cap = max(vmem_cap, 32 * 1024 * 1024)
    vmem_limit = min((vmem_cap * 3) // 4, 96 * 1024 * 1024)

    # One input block of `block_budget` bytes implies roughly:
    #   2x in + 2x out double-buffered blocks (input dtype)
    #   + ~3 f32 block-equivalents of in-kernel temporaries (upcast/product).
    f32_blow_up = 4.0 / itemsize
    overhead_blocks = 4.0 + 3.0 * f32_blow_up
    block_budget = int(vmem_limit * 0.6 / overhead_blocks)
    block_budget = max(256 * 1024, min(block_budget, 8 * 1024 * 1024))

    lane_dense = (HW % _LANE == 0)

    # ---- tile sizing --------------------------------------------------------
    if lane_dense:
        rows_total = HW // _LANE
        x_in = x.reshape(B, C, rows_total, _LANE)
        bytes_per_row = C * _LANE * itemsize          # one 128-lane row, all C

        tile_rows = max(1, block_budget // bytes_per_row)
        if tile_rows >= rows_total or rows_total < _SUBLANE:
            tile_rows = rows_total                    # equals full dim -> ok
        else:
            # Multiple of 8 keeps the (rows, 128) slab (8,128)-dense.
            # TODO(synk): for huge C (8*C*128*itemsize >> budget) split the
            # channel reduction across an "arbitrary" grid axis instead.
            tile_rows = max(_SUBLANE, (tile_rows // _SUBLANE) * _SUBLANE)

        if tile_rows == rows_total:
            tile_b = max(1, min(B, block_budget // max(1, rows_total * bytes_per_row)))
        else:
            tile_b = 1
        tile_hw = None
    else:
        rows_total = None
        x_in = x.reshape(B, C, HW)
        slab_bytes = C * HW * itemsize                # one batch element

        if slab_bytes <= block_budget or HW <= _LANE:
            tile_hw = HW                              # equals full dim -> ok
            tile_b = max(1, min(B, block_budget // max(1, slab_bytes)))
        else:
            tile_b = 1
            tile_hw = (block_budget // (C * itemsize) // _LANE) * _LANE
            tile_hw = max(_LANE, min(tile_hw, (HW // _LANE) * _LANE))
        tile_rows = None

    # ---- keep >= 2 (ideally 4) grid steps so v7x's two TCs both get work ---
    if total_bytes >= (4 << 20):
        min_steps = 4
    elif total_bytes >= (256 << 10):
        min_steps = 2
    else:
        min_steps = 1

    for _ in range(32):
        if lane_dense:
            n_spatial = pl.cdiv(rows_total, tile_rows)
        else:
            n_spatial = pl.cdiv(HW, tile_hw)
        if pl.cdiv(B, tile_b) * n_spatial >= min_steps:
            break
        if tile_b > 1:
            tile_b = (tile_b + 1) // 2
        elif lane_dense and tile_rows > _SUBLANE:
            half = pl.cdiv(tile_rows, 2)
            tile_rows = max(_SUBLANE, pl.cdiv(half, _SUBLANE) * _SUBLANE)
        elif (not lane_dense) and tile_hw > _LANE:
            half = pl.cdiv(tile_hw, 2)
            tile_hw = max(_LANE, pl.cdiv(half, _LANE) * _LANE)
        else:
            break

    # ---- grid / specs -------------------------------------------------------
    if lane_dense:
        n_spatial = pl.cdiv(rows_total, tile_rows)
        block = (tile_b, C, tile_rows, _LANE)
        index_map = lambda b, s: (b, 0, s, 0)
        out_struct = jax.ShapeDtypeStruct((B, C, rows_total, _LANE), dtype)
    else:
        n_spatial = pl.cdiv(HW, tile_hw)
        block = (tile_b, C, tile_hw)
        index_map = lambda b, s: (b, 0, s)
        out_struct = jax.ShapeDtypeStruct((B, C, HW), dtype)
    grid = (pl.cdiv(B, tile_b), n_spatial)

    out = pl.pallas_call(
        _normalize_kernel,
        out_shape=out_struct,
        grid_spec=pltpu.PrefetchScalarGridSpec(
            num_scalar_prefetch=0,
            grid=grid,
            in_specs=[pl.BlockSpec(block, index_map)],
            out_specs=pl.BlockSpec(block, index_map),
        ),
        compiler_params=pltpu.CompilerParams(
            # The channel reduction lives entirely inside one block, so both
            # grid axes are independent -> can shard across v7x's two TCs.
            dimension_semantics=("parallel", "parallel"),
            vmem_limit_bytes=int(vmem_limit),
        ),
        cost_estimate=pl.CostEstimate(
            flops=2 * B * C * HW,             # ~C adds + C muls per spatial elem
            transcendentals=0,
            bytes_accessed=2 * total_bytes,   # one read pass + one write pass
        ),
    )(x_in)

    return out.reshape(B, C, H, W)


if __name__ == "__main__":
    key = jax.random.PRNGKey(0)
    # Small NCHW input consistent with the module's forward (strictly positive
    # so the channel sum never hits zero).
    x = jax.random.uniform(key, (2, 4, 16, 16), dtype=jnp.float32) + 0.5

    out = jax.block_until_ready(normalization_layer(x))

    # Reference check in plain JAX.
    ref = x / jnp.sum(x, axis=1, keepdims=True)
    assert out.shape == x.shape
    assert jnp.allclose(out, ref, atol=1e-6, rtol=1e-6)

    print("KERNEL_OK")
</pallas_src>

<mosaic_0001>
module attributes {stable_mosaic.version = 11 : i64} {
  func.func @_normalize_kernel(%arg0: i32, %arg1: i32, %arg2: memref<2x4x2x128xf32, #tpu.memory_space<vmem>>, %arg3: memref<2x4x2x128xf32, #tpu.memory_space<vmem>>) attributes {dimension_semantics = [#tpu.dimension_semantics<parallel>, #tpu.dimension_semantics<parallel>], iteration_bounds = array<i64: 1, 1>, scalar_prefetch = 0 : i64, scratch_operands = 0 : i64, tpu.core_type = #tpu.core_type<tc>, window_params = [{transform_indices = @transform_0, window_bounds = array<i64: 2, 4, 2, 128>}, {transform_indices = @transform_1, window_bounds = array<i64: 2, 4, 2, 128>}]} {
    %c0 = arith.constant 0 : index
    %c0_0 = arith.constant 0 : index
    %c0_1 = arith.constant 0 : index
    %c0_2 = arith.constant 0 : index
    %0 = vector.load %arg2[%c0, %c0_0, %c0_1, %c0_2] : memref<2x4x2x128xf32, #tpu.memory_space<vmem>>, vector<2x4x2x128xf32>
    %cst = arith.constant dense<0.000000e+00> : vector<2x2x128xf32>
    %1 = vector.multi_reduction <add>, %0, %cst [1] : vector<2x4x2x128xf32> to vector<2x2x128xf32>
    %2 = vector.shape_cast %1 : vector<2x2x128xf32> to vector<2x1x2x128xf32>
    %3 = tpu.reciprocal %2 : vector<2x1x2x128xf32> -> vector<2x1x2x128xf32>
    %4 = vector.broadcast %3 : vector<2x1x2x128xf32> to vector<2x4x2x128xf32>
    %5 = arith.mulf %0, %4 : vector<2x4x2x128xf32>
    %c0_3 = arith.constant 0 : index
    %c0_4 = arith.constant 0 : index
    %c0_5 = arith.constant 0 : index
    %c0_6 = arith.constant 0 : index
    %6 = vector.load %arg3[%c0_3, %c0_4, %c0_5, %c0_6] : memref<2x4x2x128xf32, #tpu.memory_space<vmem>>, vector<2x4x2x128xf32>
    tpu.vector_store %arg3[%c0_3, %c0_4, %c0_5, %c0_6], %5 {strides = array<i32>} : memref<2x4x2x128xf32, #tpu.memory_space<vmem>>, vector<2x4x2x128xf32>,
    return
  }
  func.func @transform_0(%arg0: i32, %arg1: i32) -> (i32, i32, i32, i32) {
    %c0_i32 = arith.constant 0 : i32
    %c0_i32_0 = arith.constant 0 : i32
    %c0_i32_1 = arith.constant 0 : i32
    return %arg0, %c0_i32, %arg1, %c0_i32_0 : i32, i32, i32, i32
  }
  func.func @transform_1(%arg0: i32, %arg1: i32) -> (i32, i32, i32, i32) {
    %c0_i32 = arith.constant 0 : i32
    %c0_i32_0 = arith.constant 0 : i32
    %c0_i32_1 = arith.constant 0 : i32
    return %arg0, %c0_i32, %arg1, %c0_i32_0 : i32, i32, i32, i32
  }
}

</mosaic_0001>

<bundles_post_ra>
// kernel: tpu_custom_call.1
= control target key start
LH: loop header
LB: loop body
LE: loop exit
PB: predicated region body
PF: predicated region fallthrough
CT: control target
= control target key end

     0   :  { %6 = vsyncpa [#allocation3], 0  ;;  %s205_s0 = inlined_call_operand.hbm [shape: f32[2,4,2,128], index: 0, kind: input, shape index: {}]   ;;  %s206_s1 = inlined_call_operand.hbm [shape: f32[2,4,2,128], index: 1, kind: output, shape index: {}]  }
   0x1   :  { %7 = vsyncpa [#allocation4], 0  ;;  %s12_s8 = sshll.u32 %s205_s0, 4  ;;  %s171_s9 = smov [#allocation2]   ;;  %s13_s8 = int_to_ptr.hbm [resolvable:$true] %s12_s8 }
   0x2   :  { %s14_s10 = sshll.u32 %s171_s9, 4  ;;  %s172_s11 = smov 32   ;;  %s15_s10 = int_to_ptr.vmem [resolvable:$true] %s14_s10 }
   0x3   :  { %s173_s12 = smov 2  }
   0x4   :  { %20 = dma.hbm_to_vmem [thread:$0]  %s13_s8, 256, %s15_s10, [#allocation3], %s172_s11, %s172_s11, %s173_s12  }
   0x5   :  { %167 = dma.done.wait [#allocation3], 256  }
   0x6   :  { %168 = vsyncadd [#allocation3], 4294967040  ;;  %vm33_vm0 = vcmask 1041408   ;;  %v25_v0 = vld [vmem:[#allocation2] sm:$0x3]  ;;  %s174_s0 = smov [#allocation5]  }
   0x7   :  { %v26_v1 = vld [vmem:[#allocation2 + $0x2] sm:$0x3]  ;;  %v27_v2 = vld [vmem:[#allocation2 + $0x4] sm:$0x3]  ;;  %v28_v3 = vld [vmem:[#allocation2 + $0x6] sm:$0x3] }
   0x8   :  { %v34_v4 = vsel %vm33_vm0, %v25_v0, 0.0  ;;  %v35_v5 = vsel %vm33_vm0, %v26_v1, 0.0  ;;  %v37_v6 = vsel %vm33_vm0, %v27_v2, 0.0  ;;  %v39_v8 = vsel %vm33_vm0, %v28_v3, 0.0  ;;  %v29_v9 = vld [vmem:[#allocation2 + $0x8] sm:$0x3] }
   0x9   :  { %v36_v7 = vadd.f32 %v35_v5, %v34_v4  ;;  %v30_v10 = vld [vmem:[#allocation2 + $0xa] sm:$0x3]  ;;  %v31_v11 = vld [vmem:[#allocation2 + $0xc] sm:$0x3]  ;;  %v32_v12 = vld [vmem:[#allocation2 + $0xe] sm:$0x3] }
   0xa   :  { %v41_v13 = vsel %vm33_vm0, %v29_v9, 0.0  ;;  %v42_v14 = vsel %vm33_vm0, %v30_v10, 0.0  ;;  %v44_v17 = vsel %vm33_vm0, %v31_v11, 0.0  ;;  %v46_v20 = vsel %vm33_vm0, %v32_v12, 0.0  ;;  %s96_s13 = sshll.u32 %s174_s0, 4  ;;  %s98_s16 = sshll.u32 %s206_s1, 4  ;;  %s97_s13 = int_to_ptr.vmem [resolvable:$true] %s96_s13  ;;  %s99_s16 = int_to_ptr.hbm [resolvable:$true] %s98_s16 }
   0xb   :  { %v38_v15 = vadd.f32 %v37_v6, %v36_v7  ;;  %v43_v16 = vadd.f32 %v42_v14, %v41_v13 }
   0xd   :  { %v40_v18 = vadd.f32 %v39_v8, %v38_v15  ;;  %v45_v19 = vadd.f32 %v44_v17, %v43_v16 }
   0xf   :  { %115 = vrcp.f32 %v40_v18  ;;  %v47_v21 = vadd.f32 %v46_v20, %v45_v19  ;;  %v59_v24 = vand.u32 2147483648, %v40_v18  ;;  %vm53_vm1 = vweird.f32 %v40_v18 }
  0x10   :  { %v57_v27 = vand.u32 2147483647, %v40_v18 }
  0x11   :  { %117 = vrcp.f32 %v47_v21  ;;  %v60_v30 = vor.u32 1.1754944e-38, %v59_v24  ;;  %v73_v31 = vand.u32 2147483648, %v47_v21  ;;  %vm67_vm4 = vweird.f32 %v47_v21 }
  0x12   :  { %v71_v33 = vand.u32 2147483647, %v47_v21  ;;  %vm58_vm6 = vcmp.eq.f32.partialorder %v57_v27, 8.507059e+37 }
  0x13   :  { %v74_v37 = vor.u32 1.1754944e-38, %v73_v31 }
  0x14   :  { %vm72_vm8 = vcmp.eq.f32.partialorder %v71_v33, 8.507059e+37 }
  0x15   :  { %v116_v22 = vpop.eup %115 }
  0x16   :  { %v49_v23 = vmul.f32 %v116_v22, %v40_v18  ;;  %vm54_vm2 = vweird.f32 %v116_v22 }
  0x17   :  { %v118_v25 = vpop.eup %117  ;;  %vm55_vm3 = vmor %vm53_vm1, %vm54_vm2 }
  0x18   :  { %v50_v26 = vsub.f32 1.0, %v49_v23  ;;  %v63_v28 = vmul.f32 %v118_v25, %v47_v21  ;;  %vm68_vm5 = vweird.f32 %v118_v25 }
  0x19   :  { %vm69_vm7 = vmor %vm67_vm4, %vm68_vm5 }
  0x1a   :  { %v51_v29 = vmul.f32 %v116_v22, %v50_v26  ;;  %v64_v32 = vsub.f32 1.0, %v63_v28 }
  0x1c   :  { %v52_v34 = vadd.f32 %v116_v22, %v51_v29  ;;  %v65_v35 = vmul.f32 %v118_v25, %v64_v32 }
  0x1e   :  { %v56_v36 = vsel %vm55_vm3, %v116_v22, %v52_v34  ;;  %v66_v39 = vadd.f32 %v118_v25, %v65_v35 }
  0x1f   :  { %v61_v38 = vsel %vm58_vm6, %v60_v30, %v56_v36 }
  0x20   :  { %v76_v40 = vmul.f32 %v61_v38, %v25_v0  ;;  %v77_v41 = vmul.f32 %v61_v38, %v26_v1  ;;  %v78_v42 = vmul.f32 %v61_v38, %v27_v2  ;;  %v79_v43 = vmul.f32 %v61_v38, %v28_v3 }
  0x21   :  { %v70_v44 = vsel %vm69_vm7, %v118_v25, %v66_v39 }
  0x22   :  { %84 = vst [vmem:[#allocation5] sm:$0x3] %v76_v40  ;;  %v75_v45 = vsel %vm72_vm8, %v74_v37, %v70_v44 }
  0x23   :  { %85 = vst [vmem:[#allocation5 + $0x2] sm:$0x3] %v77_v41  ;;  %v80_v46 = vmul.f32 %v75_v45, %v29_v9  ;;  %v81_v47 = vmul.f32 %v75_v45, %v30_v10  ;;  %v82_v48 = vmul.f32 %v75_v45, %v31_v11  ;;  %v83_v49 = vmul.f32 %v75_v45, %v32_v12 }
  0x24   :  { %86 = vst [vmem:[#allocation5 + $0x4] sm:$0x3] %v78_v42 }
  0x25   :  { %87 = vst [vmem:[#allocation5 + $0x6] sm:$0x3] %v79_v43 }
  0x26   :  { %88 = vst [vmem:[#allocation5 + $0x8] sm:$0x3] %v80_v46 }
  0x27   :  { %89 = vst [vmem:[#allocation5 + $0xa] sm:$0x3] %v81_v47 }
  0x28   :  { %90 = vst [vmem:[#allocation5 + $0xc] sm:$0x3] %v82_v48 }
  0x29   :  { %91 = vst [vmem:[#allocation5 + $0xe] sm:$0x3] %v83_v49 }
  0x2a   :  { %104 = dma.vmem_to_hbm [thread:$0]  %s97_s13, 256, %s99_s16, [#allocation4], %s172_s11, %s172_s11, %s173_s12  }
  0x2b   :  { %169 = dma.done.wait [#allocation4], 256  }
  0x2c   :  { %170 = vsyncadd [#allocation4], 4294967040 }
  0x2d   :  { %109 = vsyncpa [#allocation3], 1 }
  0x2e   :  { %110 = vsyncpa [#allocation4], 1 }

</bundles_post_ra>
